<compile_context>
chip_gen: v5e
topology: v5e:2x2
jax: 0.10.0
libtpu: 0.0.40
codegen_flags: <defaults>
</compile_context>

<pallas_src>
import functools

import jax
import jax.numpy as jnp
from jax import lax
from jax.experimental import pallas as pl
from jax.experimental.pallas import tpu as pltpu


# ----------------------------------------------------------------------------
# Fused kernel: LSTM recurrence -> relu(l10) -> [l20 | l21] -> reparameterize.
# Single invocation, all refs whole-array resident in VMEM.
# ----------------------------------------------------------------------------
def _vae_encoder_kernel(x_ref, h02_ref, wih_ref, whh_ref, bl_ref,
                        w10h_ref, w10l_ref, b10_ref, w2_ref, b2_ref, eps_ref,
                        out_ref):
    T, B, _ = x_ref.shape
    H = whh_ref.shape[0]
    bn = eps_ref.shape[1]

    # Hoist loop-invariant weight loads / bias broadcast out of the recurrence.
    wih = wih_ref[...]                                   # (E, 4H) bf16
    whh = whh_ref[...]                                   # (H, 4H) bf16
    bl = jnp.broadcast_to(bl_ref[...], (B, 4 * H))       # (B, 4H) f32

    def step(t, carry):
        h, c = carry                                     # (B, H) f32
        x_t = x_ref[t]                                   # (B, E) bf16
        gates = (
            jnp.dot(x_t, wih, preferred_element_type=jnp.float32)
            + jnp.dot(h.astype(jnp.bfloat16), whh,
                      preferred_element_type=jnp.float32)
            + bl
        )                                                # (B, 4H) f32
        # Gate layout: [i | f | o | g] -> one sigmoid over 3H lanes, one tanh.
        sig = jax.nn.sigmoid(gates[:, :3 * H])
        i_g = sig[:, 0 * H:1 * H]
        f_g = sig[:, 1 * H:2 * H]
        o_g = sig[:, 2 * H:3 * H]
        g_g = jnp.tanh(gates[:, 3 * H:4 * H])
        c_new = f_g * c + i_g * g_g
        h_new = o_g * jnp.tanh(c_new)
        return h_new, c_new

    h0 = jnp.zeros((B, H), jnp.float32)
    c0 = jnp.zeros((B, H), jnp.float32)
    h01, _ = lax.fori_loop(0, T, step, (h0, c0), unroll=True)

    # VAE head.  concat(h01, h02) @ W10 == h01 @ W10[:H] + h02 @ W10[H:].
    h1 = jnp.maximum(
        jnp.dot(h01.astype(jnp.bfloat16), w10h_ref[...],
                preferred_element_type=jnp.float32)
        + jnp.dot(h02_ref[...], w10l_ref[...],
                  preferred_element_type=jnp.float32)
        + b10_ref[...], 0.0)                             # (B, inter) f32

    # Fused mu/logvar projection: one (inter, 2*bn) matmul.
    ml = jnp.dot(h1.astype(jnp.bfloat16), w2_ref[...],
                 preferred_element_type=jnp.float32) + b2_ref[...]   # (B, 2bn)
    mu = ml[:, :bn]
    logvar = ml[:, bn:]
    z = eps_ref[...] * jnp.exp(0.5 * logvar) + mu        # reparameterize

    # Packed output [z | mu | logvar]; split in the wrapper.
    out_ref[:, :bn] = z
    out_ref[:, bn:] = ml


def vae_encoder_fused(x_emb, h02, w_ih, w_hh, b_lstm,
                      w10_h, w10_l, b10, w2, b2, eps):
    """All operands whole-array in VMEM; single kernel invocation."""
    _, B, _ = x_emb.shape
    bn = eps.shape[1]
    vmem = lambda: pl.BlockSpec(memory_space=pltpu.MemorySpace.VMEM)
    return pl.pallas_call(
        _vae_encoder_kernel,
        out_shape=jax.ShapeDtypeStruct((B, 3 * bn), jnp.float32),
        in_specs=[vmem() for _ in range(11)],
        out_specs=vmem(),
    )(x_emb, h02, w_ih, w_hh, b_lstm, w10_h, w10_l, b10, w2, b2, eps)


# ----------------------------------------------------------------------------
# Full forward (glue: embedding lookups, dtype casts, output split in JAX).
# ----------------------------------------------------------------------------
def vae_encoder_forward(params, x_tokens, y_labels, eps):
    bf16 = jnp.bfloat16
    # Sentence encoder input: embedding lookup, time-major, bf16 MXU operands.
    x_emb = params["word_emb"][x_tokens]                 # (B, T, E)
    x_emb = jnp.transpose(x_emb, (1, 0, 2)).astype(bf16)  # (T, B, E)
    # Label embedding lookup -> h02 (concat is absorbed inside the kernel).
    h02 = params["label_emb"][y_labels].astype(bf16)     # (B, label_dim)

    out = vae_encoder_fused(
        x_emb, h02,
        params["w_ih"].astype(bf16), params["w_hh"].astype(bf16),
        params["b_lstm"],
        params["w10_h"].astype(bf16), params["w10_l"].astype(bf16),
        params["b10"],
        params["w2"].astype(bf16), params["b2"],
        eps)

    bn = eps.shape[1]
    z = out[:, :bn]
    mu = out[:, bn:2 * bn]
    logvar = out[:, 2 * bn:]
    return z, mu, logvar


def init_params(key, vocab, emb_dim, hidden_dim, label_dim, num_class,
                inter_dim, bottleneck_dim):
    ks = jax.random.split(key, 12)
    u = lambda k, shape, a: jax.random.uniform(k, shape, jnp.float32, -a, a)
    s_l = 1.0 / jnp.sqrt(hidden_dim)
    s_10 = 1.0 / jnp.sqrt(hidden_dim + label_dim)
    s_2 = 1.0 / jnp.sqrt(inter_dim)
    return {
        # SentEncoder (stand-in) params; LSTM gate columns ordered [i, f, o, g].
        "word_emb": u(ks[0], (vocab, emb_dim), 1.0),
        "w_ih": u(ks[1], (emb_dim, 4 * hidden_dim), s_l),
        "w_hh": u(ks[2], (hidden_dim, 4 * hidden_dim), s_l),
        "b_lstm": u(ks[3], (1, 4 * hidden_dim), s_l),     # = b_ih + b_hh
        # LabelEmb.weight.uniform_(-1, 1)
        "label_emb": u(ks[4], (num_class, label_dim), 1.0),
        # l10 split so the kernel can absorb the concat:
        #   w10_h acts on h01 (hidden_dim rows), w10_l on h02 (label_dim rows).
        "w10_h": u(ks[5], (hidden_dim, inter_dim), s_10),
        "w10_l": u(ks[6], (label_dim, inter_dim), s_10),
        "b10": u(ks[7], (1, inter_dim), s_10),
        # l20 / l21 fused into one (inter, 2*bn) weight: [w20 | w21].
        "w2": u(ks[8], (inter_dim, 2 * bottleneck_dim), s_2),
        "b2": u(ks[9], (1, 2 * bottleneck_dim), s_2),
    }


if __name__ == "__main__":
    # Small shapes consistent with the module's forward.
    # (For real workloads B >= 8 — ideally 128+ — to fill sublanes / MXU rows.)
    B, T = 2, 8                       # batch, sequence length
    VOCAB, EMB = 50, 16               # vocab / word-embedding dim
    HIDDEN, LABEL = 32, 8             # opt['hidden_dim'], opt['label_dim']
    NUM_CLASS = 5                     # opt['num_class']
    INTER, BOTTLENECK = 200, 16       # opt['inter_dim']=200, opt['bottleneck_dim']

    key = jax.random.PRNGKey(0)
    k_par, k_x, k_y, k_eps = jax.random.split(key, 4)
    params = init_params(k_par, VOCAB, EMB, HIDDEN, LABEL, NUM_CLASS,
                         INTER, BOTTLENECK)

    x = jax.random.randint(k_x, (B, T), 0, VOCAB)        # token ids
    y = jax.random.randint(k_y, (B,), 0, NUM_CLASS)      # class labels
    eps = jax.random.normal(k_eps, (B, BOTTLENECK), jnp.float32)  # randn_like(std)

    z, mu, logvar = jax.jit(functools.partial(vae_encoder_forward, params))(x, y, eps)
    jax.block_until_ready((z, mu, logvar))

    assert z.shape == (B, BOTTLENECK) and mu.shape == (B, BOTTLENECK) \
        and logvar.shape == (B, BOTTLENECK)
    assert bool(jnp.all(jnp.isfinite(z))) and bool(jnp.all(jnp.isfinite(mu))) \
        and bool(jnp.all(jnp.isfinite(logvar)))
    print("KERNEL_OK")
</pallas_src>

<mosaic_0001>
module attributes {stable_mosaic.version = 11 : i64} {
  func.func @_vae_encoder_kernel(%arg0: memref<8x2x16xbf16, #tpu.memory_space<vmem>>, %arg1: memref<2x8xbf16, #tpu.memory_space<vmem>>, %arg2: memref<16x128xbf16, #tpu.memory_space<vmem>>, %arg3: memref<32x128xbf16, #tpu.memory_space<vmem>>, %arg4: memref<1x128xf32, #tpu.memory_space<vmem>>, %arg5: memref<32x200xbf16, #tpu.memory_space<vmem>>, %arg6: memref<8x200xbf16, #tpu.memory_space<vmem>>, %arg7: memref<1x200xf32, #tpu.memory_space<vmem>>, %arg8: memref<200x32xbf16, #tpu.memory_space<vmem>>, %arg9: memref<1x32xf32, #tpu.memory_space<vmem>>, %arg10: memref<2x16xf32, #tpu.memory_space<vmem>>, %arg11: memref<2x48xf32, #tpu.memory_space<vmem>>) attributes {dimension_semantics = [], scalar_prefetch = 0 : i64, scratch_operands = 0 : i64, tpu.core_type = #tpu.core_type<tc>} {
    %c0 = arith.constant 0 : index
    %c0_0 = arith.constant 0 : index
    %0 = vector.load %arg2[%c0, %c0_0] : memref<16x128xbf16, #tpu.memory_space<vmem>>, vector<16x128xbf16>
    %c0_1 = arith.constant 0 : index
    %c0_2 = arith.constant 0 : index
    %1 = vector.load %arg3[%c0_1, %c0_2] : memref<32x128xbf16, #tpu.memory_space<vmem>>, vector<32x128xbf16>
    %c0_3 = arith.constant 0 : index
    %c0_4 = arith.constant 0 : index
    %2 = vector.load %arg4[%c0_3, %c0_4] : memref<1x128xf32, #tpu.memory_space<vmem>>, vector<1x128xf32>
    %3 = vector.shape_cast %2 : vector<1x128xf32> to vector<1x128xf32>
    %4 = vector.broadcast %3 : vector<1x128xf32> to vector<2x128xf32>
    %cst = arith.constant 0.000000e+00 : f32
    %5 = vector.broadcast %cst : f32 to vector<2x32xf32>
    %cst_5 = arith.constant 0.000000e+00 : f32
    %6 = vector.broadcast %cst_5 : f32 to vector<2x32xf32>
    %c0_i32 = arith.constant 0 : i32
    %7 = arith.index_cast %c0_i32 : i32 to index
    %c0_6 = arith.constant 0 : index
    %c0_7 = arith.constant 0 : index
    %8 = vector.load %arg0[%7, %c0_6, %c0_7] : memref<8x2x16xbf16, #tpu.memory_space<vmem>>, vector<1x2x16xbf16>
    %9 = vector.shape_cast %8 : vector<1x2x16xbf16> to vector<2x16xbf16>
    %cst_8 = arith.constant dense<0.000000e+00> : vector<2x128xf32>
    %10 = tpu.matmul %9, %0, %cst_8 {dimension_numbers = #tpu.dot_dimension_numbers<[1], [0], [0], [1], [0, 0, 1, 1], [], []>} : vector<2x16xbf16>, vector<16x128xbf16>, vector<2x128xf32> -> vector<2x128xf32>
    %11 = arith.truncf %5 : vector<2x32xf32> to vector<2x32xbf16>
    %cst_9 = arith.constant dense<0.000000e+00> : vector<2x128xf32>
    %12 = tpu.matmul %11, %1, %cst_9 {dimension_numbers = #tpu.dot_dimension_numbers<[1], [0], [0], [1], [0, 0, 1, 1], [], []>} : vector<2x32xbf16>, vector<32x128xbf16>, vector<2x128xf32> -> vector<2x128xf32>
    %13 = arith.addf %10, %12 : vector<2x128xf32>
    %14 = arith.addf %13, %4 : vector<2x128xf32>
    %15 = vector.extract_strided_slice %14 {offsets = [0, 0], sizes = [2, 96], strides = [1, 1]} : vector<2x128xf32> to vector<2x96xf32>
    %16 = arith.negf %15 : vector<2x96xf32>
    %17 = math.exp %16 : vector<2x96xf32>
    %cst_10 = arith.constant 1.000000e+00 : f32
    %18 = vector.broadcast %cst_10 : f32 to vector<2x96xf32>
    %19 = arith.addf %18, %17 : vector<2x96xf32>
    %20 = arith.divf %18, %19 : vector<2x96xf32>
    %21 = vector.extract_strided_slice %20 {offsets = [0, 0], sizes = [2, 32], strides = [1, 1]} : vector<2x96xf32> to vector<2x32xf32>
    %22 = vector.extract_strided_slice %20 {offsets = [0, 32], sizes = [2, 32], strides = [1, 1]} : vector<2x96xf32> to vector<2x32xf32>
    %23 = vector.extract_strided_slice %20 {offsets = [0, 64], sizes = [2, 32], strides = [1, 1]} : vector<2x96xf32> to vector<2x32xf32>
    %24 = vector.extract_strided_slice %14 {offsets = [0, 96], sizes = [2, 32], strides = [1, 1]} : vector<2x128xf32> to vector<2x32xf32>
    %25 = math.tanh %24 : vector<2x32xf32>
    %26 = arith.mulf %22, %6 : vector<2x32xf32>
    %27 = arith.mulf %21, %25 : vector<2x32xf32>
    %28 = arith.addf %26, %27 : vector<2x32xf32>
    %29 = math.tanh %28 : vector<2x32xf32>
    %30 = arith.mulf %23, %29 : vector<2x32xf32>
    %c1_i32 = arith.constant 1 : i32
    %31 = arith.index_cast %c1_i32 : i32 to index
    %c0_11 = arith.constant 0 : index
    %c0_12 = arith.constant 0 : index
    %32 = vector.load %arg0[%31, %c0_11, %c0_12] : memref<8x2x16xbf16, #tpu.memory_space<vmem>>, vector<1x2x16xbf16>
    %33 = vector.shape_cast %32 : vector<1x2x16xbf16> to vector<2x16xbf16>
    %cst_13 = arith.constant dense<0.000000e+00> : vector<2x128xf32>
    %34 = tpu.matmul %33, %0, %cst_13 {dimension_numbers = #tpu.dot_dimension_numbers<[1], [0], [0], [1], [0, 0, 1, 1], [], []>} : vector<2x16xbf16>, vector<16x128xbf16>, vector<2x128xf32> -> vector<2x128xf32>
    %35 = arith.truncf %30 : vector<2x32xf32> to vector<2x32xbf16>
    %cst_14 = arith.constant dense<0.000000e+00> : vector<2x128xf32>
    %36 = tpu.matmul %35, %1, %cst_14 {dimension_numbers = #tpu.dot_dimension_numbers<[1], [0], [0], [1], [0, 0, 1, 1], [], []>} : vector<2x32xbf16>, vector<32x128xbf16>, vector<2x128xf32> -> vector<2x128xf32>
    %37 = arith.addf %34, %36 : vector<2x128xf32>
    %38 = arith.addf %37, %4 : vector<2x128xf32>
    %39 = vector.extract_strided_slice %38 {offsets = [0, 0], sizes = [2, 96], strides = [1, 1]} : vector<2x128xf32> to vector<2x96xf32>
    %40 = arith.negf %39 : vector<2x96xf32>
    %41 = math.exp %40 : vector<2x96xf32>
    %cst_15 = arith.constant 1.000000e+00 : f32
    %42 = vector.broadcast %cst_15 : f32 to vector<2x96xf32>
    %43 = arith.addf %42, %41 : vector<2x96xf32>
    %44 = arith.divf %42, %43 : vector<2x96xf32>
    %45 = vector.extract_strided_slice %44 {offsets = [0, 0], sizes = [2, 32], strides = [1, 1]} : vector<2x96xf32> to vector<2x32xf32>
    %46 = vector.extract_strided_slice %44 {offsets = [0, 32], sizes = [2, 32], strides = [1, 1]} : vector<2x96xf32> to vector<2x32xf32>
    %47 = vector.extract_strided_slice %44 {offsets = [0, 64], sizes = [2, 32], strides = [1, 1]} : vector<2x96xf32> to vector<2x32xf32>
    %48 = vector.extract_strided_slice %38 {offsets = [0, 96], sizes = [2, 32], strides = [1, 1]} : vector<2x128xf32> to vector<2x32xf32>
    %49 = math.tanh %48 : vector<2x32xf32>
    %50 = arith.mulf %46, %28 : vector<2x32xf32>
    %51 = arith.mulf %45, %49 : vector<2x32xf32>
    %52 = arith.addf %50, %51 : vector<2x32xf32>
    %53 = math.tanh %52 : vector<2x32xf32>
    %54 = arith.mulf %47, %53 : vector<2x32xf32>
    %c2_i32 = arith.constant 2 : i32
    %55 = arith.index_cast %c2_i32 : i32 to index
    %c0_16 = arith.constant 0 : index
    %c0_17 = arith.constant 0 : index
    %56 = vector.load %arg0[%55, %c0_16, %c0_17] : memref<8x2x16xbf16, #tpu.memory_space<vmem>>, vector<1x2x16xbf16>
    %57 = vector.shape_cast %56 : vector<1x2x16xbf16> to vector<2x16xbf16>
    %cst_18 = arith.constant dense<0.000000e+00> : vector<2x128xf32>
    %58 = tpu.matmul %57, %0, %cst_18 {dimension_numbers = #tpu.dot_dimension_numbers<[1], [0], [0], [1], [0, 0, 1, 1], [], []>} : vector<2x16xbf16>, vector<16x128xbf16>, vector<2x128xf32> -> vector<2x128xf32>
    %59 = arith.truncf %54 : vector<2x32xf32> to vector<2x32xbf16>
    %cst_19 = arith.constant dense<0.000000e+00> : vector<2x128xf32>
    %60 = tpu.matmul %59, %1, %cst_19 {dimension_numbers = #tpu.dot_dimension_numbers<[1], [0], [0], [1], [0, 0, 1, 1], [], []>} : vector<2x32xbf16>, vector<32x128xbf16>, vector<2x128xf32> -> vector<2x128xf32>
    %61 = arith.addf %58, %60 : vector<2x128xf32>
    %62 = arith.addf %61, %4 : vector<2x128xf32>
    %63 = vector.extract_strided_slice %62 {offsets = [0, 0], sizes = [2, 96], strides = [1, 1]} : vector<2x128xf32> to vector<2x96xf32>
    %64 = arith.negf %63 : vector<2x96xf32>
    %65 = math.exp %64 : vector<2x96xf32>
    %cst_20 = arith.constant 1.000000e+00 : f32
    %66 = vector.broadcast %cst_20 : f32 to vector<2x96xf32>
    %67 = arith.addf %66, %65 : vector<2x96xf32>
    %68 = arith.divf %66, %67 : vector<2x96xf32>
    %69 = vector.extract_strided_slice %68 {offsets = [0, 0], sizes = [2, 32], strides = [1, 1]} : vector<2x96xf32> to vector<2x32xf32>
    %70 = vector.extract_strided_slice %68 {offsets = [0, 32], sizes = [2, 32], strides = [1, 1]} : vector<2x96xf32> to vector<2x32xf32>
    %71 = vector.extract_strided_slice %68 {offsets = [0, 64], sizes = [2, 32], strides = [1, 1]} : vector<2x96xf32> to vector<2x32xf32>
    %72 = vector.extract_strided_slice %62 {offsets = [0, 96], sizes = [2, 32], strides = [1, 1]} : vector<2x128xf32> to vector<2x32xf32>
    %73 = math.tanh %72 : vector<2x32xf32>
    %74 = arith.mulf %70, %52 : vector<2x32xf32>
    %75 = arith.mulf %69, %73 : vector<2x32xf32>
    %76 = arith.addf %74, %75 : vector<2x32xf32>
    %77 = math.tanh %76 : vector<2x32xf32>
    %78 = arith.mulf %71, %77 : vector<2x32xf32>
    %c3_i32 = arith.constant 3 : i32
    %79 = arith.index_cast %c3_i32 : i32 to index
    %c0_21 = arith.constant 0 : index
    %c0_22 = arith.constant 0 : index
    %80 = vector.load %arg0[%79, %c0_21, %c0_22] : memref<8x2x16xbf16, #tpu.memory_space<vmem>>, vector<1x2x16xbf16>
    %81 = vector.shape_cast %80 : vector<1x2x16xbf16> to vector<2x16xbf16>
    %cst_23 = arith.constant dense<0.000000e+00> : vector<2x128xf32>
    %82 = tpu.matmul %81, %0, %cst_23 {dimension_numbers = #tpu.dot_dimension_numbers<[1], [0], [0], [1], [0, 0, 1, 1], [], []>} : vector<2x16xbf16>, vector<16x128xbf16>, vector<2x128xf32> -> vector<2x128xf32>
    %83 = arith.truncf %78 : vector<2x32xf32> to vector<2x32xbf16>
    %cst_24 = arith.constant dense<0.000000e+00> : vector<2x128xf32>
    %84 = tpu.matmul %83, %1, %cst_24 {dimension_numbers = #tpu.dot_dimension_numbers<[1], [0], [0], [1], [0, 0, 1, 1], [], []>} : vector<2x32xbf16>, vector<32x128xbf16>, vector<2x128xf32> -> vector<2x128xf32>
    %85 = arith.addf %82, %84 : vector<2x128xf32>
    %86 = arith.addf %85, %4 : vector<2x128xf32>
    %87 = vector.extract_strided_slice %86 {offsets = [0, 0], sizes = [2, 96], strides = [1, 1]} : vector<2x128xf32> to vector<2x96xf32>
    %88 = arith.negf %87 : vector<2x96xf32>
    %89 = math.exp %88 : vector<2x96xf32>
    %cst_25 = arith.constant 1.000000e+00 : f32
    %90 = vector.broadcast %cst_25 : f32 to vector<2x96xf32>
    %91 = arith.addf %90, %89 : vector<2x96xf32>
    %92 = arith.divf %90, %91 : vector<2x96xf32>
    %93 = vector.extract_strided_slice %92 {offsets = [0, 0], sizes = [2, 32], strides = [1, 1]} : vector<2x96xf32> to vector<2x32xf32>
    %94 = vector.extract_strided_slice %92 {offsets = [0, 32], sizes = [2, 32], strides = [1, 1]} : vector<2x96xf32> to vector<2x32xf32>
    %95 = vector.extract_strided_slice %92 {offsets = [0, 64], sizes = [2, 32], strides = [1, 1]} : vector<2x96xf32> to vector<2x32xf32>
    %96 = vector.extract_strided_slice %86 {offsets = [0, 96], sizes = [2, 32], strides = [1, 1]} : vector<2x128xf32> to vector<2x32xf32>
    %97 = math.tanh %96 : vector<2x32xf32>
    %98 = arith.mulf %94, %76 : vector<2x32xf32>
    %99 = arith.mulf %93, %97 : vector<2x32xf32>
    %100 = arith.addf %98, %99 : vector<2x32xf32>
    %101 = math.tanh %100 : vector<2x32xf32>
    %102 = arith.mulf %95, %101 : vector<2x32xf32>
    %c4_i32 = arith.constant 4 : i32
    %103 = arith.index_cast %c4_i32 : i32 to index
    %c0_26 = arith.constant 0 : index
    %c0_27 = arith.constant 0 : index
    %104 = vector.load %arg0[%103, %c0_26, %c0_27] : memref<8x2x16xbf16, #tpu.memory_space<vmem>>, vector<1x2x16xbf16>
    %105 = vector.shape_cast %104 : vector<1x2x16xbf16> to vector<2x16xbf16>
    %cst_28 = arith.constant dense<0.000000e+00> : vector<2x128xf32>
    %106 = tpu.matmul %105, %0, %cst_28 {dimension_numbers = #tpu.dot_dimension_numbers<[1], [0], [0], [1], [0, 0, 1, 1], [], []>} : vector<2x16xbf16>, vector<16x128xbf16>, vector<2x128xf32> -> vector<2x128xf32>
    %107 = arith.truncf %102 : vector<2x32xf32> to vector<2x32xbf16>
    %cst_29 = arith.constant dense<0.000000e+00> : vector<2x128xf32>
    %108 = tpu.matmul %107, %1, %cst_29 {dimension_numbers = #tpu.dot_dimension_numbers<[1], [0], [0], [1], [0, 0, 1, 1], [], []>} : vector<2x32xbf16>, vector<32x128xbf16>, vector<2x128xf32> -> vector<2x128xf32>
    %109 = arith.addf %106, %108 : vector<2x128xf32>
    %110 = arith.addf %109, %4 : vector<2x128xf32>
    %111 = vector.extract_strided_slice %110 {offsets = [0, 0], sizes = [2, 96], strides = [1, 1]} : vector<2x128xf32> to vector<2x96xf32>
    %112 = arith.negf %111 : vector<2x96xf32>
    %113 = math.exp %112 : vector<2x96xf32>
    %cst_30 = arith.constant 1.000000e+00 : f32
    %114 = vector.broadcast %cst_30 : f32 to vector<2x96xf32>
    %115 = arith.addf %114, %113 : vector<2x96xf32>
    %116 = arith.divf %114, %115 : vector<2x96xf32>
    %117 = vector.extract_strided_slice %116 {offsets = [0, 0], sizes = [2, 32], strides = [1, 1]} : vector<2x96xf32> to vector<2x32xf32>
    %118 = vector.extract_strided_slice %116 {offsets = [0, 32], sizes = [2, 32], strides = [1, 1]} : vector<2x96xf32> to vector<2x32xf32>
    %119 = vector.extract_strided_slice %116 {offsets = [0, 64], sizes = [2, 32], strides = [1, 1]} : vector<2x96xf32> to vector<2x32xf32>
    %120 = vector.extract_strided_slice %110 {offsets = [0, 96], sizes = [2, 32], strides = [1, 1]} : vector<2x128xf32> to vector<2x32xf32>
    %121 = math.tanh %120 : vector<2x32xf32>
    %122 = arith.mulf %118, %100 : vector<2x32xf32>
    %123 = arith.mulf %117, %121 : vector<2x32xf32>
    %124 = arith.addf %122, %123 : vector<2x32xf32>
    %125 = math.tanh %124 : vector<2x32xf32>
    %126 = arith.mulf %119, %125 : vector<2x32xf32>
    %c5_i32 = arith.constant 5 : i32
    %127 = arith.index_cast %c5_i32 : i32 to index
    %c0_31 = arith.constant 0 : index
    %c0_32 = arith.constant 0 : index
    %128 = vector.load %arg0[%127, %c0_31, %c0_32] : memref<8x2x16xbf16, #tpu.memory_space<vmem>>, vector<1x2x16xbf16>
    %129 = vector.shape_cast %128 : vector<1x2x16xbf16> to vector<2x16xbf16>
    %cst_33 = arith.constant dense<0.000000e+00> : vector<2x128xf32>
    %130 = tpu.matmul %129, %0, %cst_33 {dimension_numbers = #tpu.dot_dimension_numbers<[1], [0], [0], [1], [0, 0, 1, 1], [], []>} : vector<2x16xbf16>, vector<16x128xbf16>, vector<2x128xf32> -> vector<2x128xf32>
    %131 = arith.truncf %126 : vector<2x32xf32> to vector<2x32xbf16>
    %cst_34 = arith.constant dense<0.000000e+00> : vector<2x128xf32>
    %132 = tpu.matmul %131, %1, %cst_34 {dimension_numbers = #tpu.dot_dimension_numbers<[1], [0], [0], [1], [0, 0, 1, 1], [], []>} : vector<2x32xbf16>, vector<32x128xbf16>, vector<2x128xf32> -> vector<2x128xf32>
    %133 = arith.addf %130, %132 : vector<2x128xf32>
    %134 = arith.addf %133, %4 : vector<2x128xf32>
    %135 = vector.extract_strided_slice %134 {offsets = [0, 0], sizes = [2, 96], strides = [1, 1]} : vector<2x128xf32> to vector<2x96xf32>
    %136 = arith.negf %135 : vector<2x96xf32>
    %137 = math.exp %136 : vector<2x96xf32>
    %cst_35 = arith.constant 1.000000e+00 : f32
    %138 = vector.broadcast %cst_35 : f32 to vector<2x96xf32>
    %139 = arith.addf %138, %137 : vector<2x96xf32>
    %140 = arith.divf %138, %139 : vector<2x96xf32>
    %141 = vector.extract_strided_slice %140 {offsets = [0, 0], sizes = [2, 32], strides = [1, 1]} : vector<2x96xf32> to vector<2x32xf32>
    %142 = vector.extract_strided_slice %140 {offsets = [0, 32], sizes = [2, 32], strides = [1, 1]} : vector<2x96xf32> to vector<2x32xf32>
    %143 = vector.extract_strided_slice %140 {offsets = [0, 64], sizes = [2, 32], strides = [1, 1]} : vector<2x96xf32> to vector<2x32xf32>
    %144 = vector.extract_strided_slice %134 {offsets = [0, 96], sizes = [2, 32], strides = [1, 1]} : vector<2x128xf32> to vector<2x32xf32>
    %145 = math.tanh %144 : vector<2x32xf32>
    %146 = arith.mulf %142, %124 : vector<2x32xf32>
    %147 = arith.mulf %141, %145 : vector<2x32xf32>
    %148 = arith.addf %146, %147 : vector<2x32xf32>
    %149 = math.tanh %148 : vector<2x32xf32>
    %150 = arith.mulf %143, %149 : vector<2x32xf32>
    %c6_i32 = arith.constant 6 : i32
    %151 = arith.index_cast %c6_i32 : i32 to index
    %c0_36 = arith.constant 0 : index
    %c0_37 = arith.constant 0 : index
    %152 = vector.load %arg0[%151, %c0_36, %c0_37] : memref<8x2x16xbf16, #tpu.memory_space<vmem>>, vector<1x2x16xbf16>
    %153 = vector.shape_cast %152 : vector<1x2x16xbf16> to vector<2x16xbf16>
    %cst_38 = arith.constant dense<0.000000e+00> : vector<2x128xf32>
    %154 = tpu.matmul %153, %0, %cst_38 {dimension_numbers = #tpu.dot_dimension_numbers<[1], [0], [0], [1], [0, 0, 1, 1], [], []>} : vector<2x16xbf16>, vector<16x128xbf16>, vector<2x128xf32> -> vector<2x128xf32>
    %155 = arith.truncf %150 : vector<2x32xf32> to vector<2x32xbf16>
    %cst_39 = arith.constant dense<0.000000e+00> : vector<2x128xf32>
    %156 = tpu.matmul %155, %1, %cst_39 {dimension_numbers = #tpu.dot_dimension_numbers<[1], [0], [0], [1], [0, 0, 1, 1], [], []>} : vector<2x32xbf16>, vector<32x128xbf16>, vector<2x128xf32> -> vector<2x128xf32>
    %157 = arith.addf %154, %156 : vector<2x128xf32>
    %158 = arith.addf %157, %4 : vector<2x128xf32>
    %159 = vector.extract_strided_slice %158 {offsets = [0, 0], sizes = [2, 96], strides = [1, 1]} : vector<2x128xf32> to vector<2x96xf32>
    %160 = arith.negf %159 : vector<2x96xf32>
    %161 = math.exp %160 : vector<2x96xf32>
    %cst_40 = arith.constant 1.000000e+00 : f32
    %162 = vector.broadcast %cst_40 : f32 to vector<2x96xf32>
    %163 = arith.addf %162, %161 : vector<2x96xf32>
    %164 = arith.divf %162, %163 : vector<2x96xf32>
    %165 = vector.extract_strided_slice %164 {offsets = [0, 0], sizes = [2, 32], strides = [1, 1]} : vector<2x96xf32> to vector<2x32xf32>
    %166 = vector.extract_strided_slice %164 {offsets = [0, 32], sizes = [2, 32], strides = [1, 1]} : vector<2x96xf32> to vector<2x32xf32>
    %167 = vector.extract_strided_slice %164 {offsets = [0, 64], sizes = [2, 32], strides = [1, 1]} : vector<2x96xf32> to vector<2x32xf32>
    %168 = vector.extract_strided_slice %158 {offsets = [0, 96], sizes = [2, 32], strides = [1, 1]} : vector<2x128xf32> to vector<2x32xf32>
    %169 = math.tanh %168 : vector<2x32xf32>
    %170 = arith.mulf %166, %148 : vector<2x32xf32>
    %171 = arith.mulf %165, %169 : vector<2x32xf32>
    %172 = arith.addf %170, %171 : vector<2x32xf32>
    %173 = math.tanh %172 : vector<2x32xf32>
    %174 = arith.mulf %167, %173 : vector<2x32xf32>
    %c7_i32 = arith.constant 7 : i32
    %175 = arith.index_cast %c7_i32 : i32 to index
    %c0_41 = arith.constant 0 : index
    %c0_42 = arith.constant 0 : index
    %176 = vector.load %arg0[%175, %c0_41, %c0_42] : memref<8x2x16xbf16, #tpu.memory_space<vmem>>, vector<1x2x16xbf16>
    %177 = vector.shape_cast %176 : vector<1x2x16xbf16> to vector<2x16xbf16>
    %cst_43 = arith.constant dense<0.000000e+00> : vector<2x128xf32>
    %178 = tpu.matmul %177, %0, %cst_43 {dimension_numbers = #tpu.dot_dimension_numbers<[1], [0], [0], [1], [0, 0, 1, 1], [], []>} : vector<2x16xbf16>, vector<16x128xbf16>, vector<2x128xf32> -> vector<2x128xf32>
    %179 = arith.truncf %174 : vector<2x32xf32> to vector<2x32xbf16>
    %cst_44 = arith.constant dense<0.000000e+00> : vector<2x128xf32>
    %180 = tpu.matmul %179, %1, %cst_44 {dimension_numbers = #tpu.dot_dimension_numbers<[1], [0], [0], [1], [0, 0, 1, 1], [], []>} : vector<2x32xbf16>, vector<32x128xbf16>, vector<2x128xf32> -> vector<2x128xf32>
    %181 = arith.addf %178, %180 : vector<2x128xf32>
    %182 = arith.addf %181, %4 : vector<2x128xf32>
    %183 = vector.extract_strided_slice %182 {offsets = [0, 0], sizes = [2, 96], strides = [1, 1]} : vector<2x128xf32> to vector<2x96xf32>
    %184 = arith.negf %183 : vector<2x96xf32>
    %185 = math.exp %184 : vector<2x96xf32>
    %cst_45 = arith.constant 1.000000e+00 : f32
    %186 = vector.broadcast %cst_45 : f32 to vector<2x96xf32>
    %187 = arith.addf %186, %185 : vector<2x96xf32>
    %188 = arith.divf %186, %187 : vector<2x96xf32>
    %189 = vector.extract_strided_slice %188 {offsets = [0, 0], sizes = [2, 32], strides = [1, 1]} : vector<2x96xf32> to vector<2x32xf32>
    %190 = vector.extract_strided_slice %188 {offsets = [0, 32], sizes = [2, 32], strides = [1, 1]} : vector<2x96xf32> to vector<2x32xf32>
    %191 = vector.extract_strided_slice %188 {offsets = [0, 64], sizes = [2, 32], strides = [1, 1]} : vector<2x96xf32> to vector<2x32xf32>
    %192 = vector.extract_strided_slice %182 {offsets = [0, 96], sizes = [2, 32], strides = [1, 1]} : vector<2x128xf32> to vector<2x32xf32>
    %193 = math.tanh %192 : vector<2x32xf32>
    %194 = arith.mulf %190, %172 : vector<2x32xf32>
    %195 = arith.mulf %189, %193 : vector<2x32xf32>
    %196 = arith.addf %194, %195 : vector<2x32xf32>
    %197 = math.tanh %196 : vector<2x32xf32>
    %198 = arith.mulf %191, %197 : vector<2x32xf32>
    %c8_i32 = arith.constant 8 : i32
    %199 = arith.truncf %198 : vector<2x32xf32> to vector<2x32xbf16>
    %c0_46 = arith.constant 0 : index
    %c0_47 = arith.constant 0 : index
    %200 = vector.load %arg5[%c0_46, %c0_47] : memref<32x200xbf16, #tpu.memory_space<vmem>>, vector<32x200xbf16>
    %cst_48 = arith.constant dense<0.000000e+00> : vector<2x200xf32>
    %201 = tpu.matmul %199, %200, %cst_48 {dimension_numbers = #tpu.dot_dimension_numbers<[1], [0], [0], [1], [0, 0, 1, 1], [], []>} : vector<2x32xbf16>, vector<32x200xbf16>, vector<2x200xf32> -> vector<2x200xf32>
    %c0_49 = arith.constant 0 : index
    %c0_50 = arith.constant 0 : index
    %202 = vector.load %arg1[%c0_49, %c0_50] : memref<2x8xbf16, #tpu.memory_space<vmem>>, vector<2x8xbf16>
    %c0_51 = arith.constant 0 : index
    %c0_52 = arith.constant 0 : index
    %203 = vector.load %arg6[%c0_51, %c0_52] : memref<8x200xbf16, #tpu.memory_space<vmem>>, vector<8x200xbf16>
    %cst_53 = arith.constant dense<0.000000e+00> : vector<2x200xf32>
    %204 = tpu.matmul %202, %203, %cst_53 {dimension_numbers = #tpu.dot_dimension_numbers<[1], [0], [0], [1], [0, 0, 1, 1], [], []>} : vector<2x8xbf16>, vector<8x200xbf16>, vector<2x200xf32> -> vector<2x200xf32>
    %205 = arith.addf %201, %204 : vector<2x200xf32>
    %c0_54 = arith.constant 0 : index
    %c0_55 = arith.constant 0 : index
    %206 = vector.load %arg7[%c0_54, %c0_55] : memref<1x200xf32, #tpu.memory_space<vmem>>, vector<1x200xf32>
    %207 = vector.broadcast %206 : vector<1x200xf32> to vector<2x200xf32>
    %208 = arith.addf %205, %207 : vector<2x200xf32>
    %cst_56 = arith.constant 0.000000e+00 : f32
    %209 = vector.broadcast %cst_56 : f32 to vector<2x200xf32>
    %210 = arith.maximumf %208, %209 : vector<2x200xf32>
    %211 = arith.truncf %210 : vector<2x200xf32> to vector<2x200xbf16>
    %c0_57 = arith.constant 0 : index
    %c0_58 = arith.constant 0 : index
    %212 = vector.load %arg8[%c0_57, %c0_58] : memref<200x32xbf16, #tpu.memory_space<vmem>>, vector<200x32xbf16>
    %cst_59 = arith.constant dense<0.000000e+00> : vector<2x32xf32>
    %213 = tpu.matmul %211, %212, %cst_59 {dimension_numbers = #tpu.dot_dimension_numbers<[1], [0], [0], [1], [0, 0, 1, 1], [], []>} : vector<2x200xbf16>, vector<200x32xbf16>, vector<2x32xf32> -> vector<2x32xf32>
    %c0_60 = arith.constant 0 : index
    %c0_61 = arith.constant 0 : index
    %214 = vector.load %arg9[%c0_60, %c0_61] : memref<1x32xf32, #tpu.memory_space<vmem>>, vector<1x32xf32>
    %215 = vector.broadcast %214 : vector<1x32xf32> to vector<2x32xf32>
    %216 = arith.addf %213, %215 : vector<2x32xf32>
    %217 = vector.extract_strided_slice %216 {offsets = [0, 0], sizes = [2, 16], strides = [1, 1]} : vector<2x32xf32> to vector<2x16xf32>
    %218 = vector.extract_strided_slice %216 {offsets = [0, 16], sizes = [2, 16], strides = [1, 1]} : vector<2x32xf32> to vector<2x16xf32>
    %c0_62 = arith.constant 0 : index
    %c0_63 = arith.constant 0 : index
    %219 = vector.load %arg10[%c0_62, %c0_63] : memref<2x16xf32, #tpu.memory_space<vmem>>, vector<2x16xf32>
    %cst_64 = arith.constant 5.000000e-01 : f32
    %220 = vector.broadcast %cst_64 : f32 to vector<2x16xf32>
    %221 = arith.mulf %220, %218 : vector<2x16xf32>
    %222 = math.exp %221 : vector<2x16xf32>
    %223 = arith.mulf %219, %222 : vector<2x16xf32>
    %224 = arith.addf %223, %217 : vector<2x16xf32>
    %c0_65 = arith.constant 0 : index
    %c0_66 = arith.constant 0 : index
    %225 = vector.load %arg11[%c0_65, %c0_66] : memref<2x48xf32, #tpu.memory_space<vmem>>, vector<2x16xf32>
    tpu.vector_store %arg11[%c0_65, %c0_66], %224 {strides = array<i32>} : memref<2x48xf32, #tpu.memory_space<vmem>>, vector<2x16xf32>,
    %c0_67 = arith.constant 0 : index
    %c16 = arith.constant 16 : index
    %226 = vector.load %arg11[%c0_67, %c16] : memref<2x48xf32, #tpu.memory_space<vmem>>, vector<2x32xf32>
    tpu.vector_store %arg11[%c0_67, %c16], %216 {strides = array<i32>} : memref<2x48xf32, #tpu.memory_space<vmem>>, vector<2x32xf32>,
    return
  }
}

</mosaic_0001>

<bundles_post_ra>
// kernel: vae_encoder_forward.1
= control target key start
LH: loop header
LB: loop body
LE: loop exit
PB: predicated region body
PF: predicated region fallthrough
CT: control target
= control target key end

     0   :  { %16 = vsyncpa [#allocation3], 0  ;;  %s1192_s20 = smov [#allocation2]   ;;  %s1193_s22 = smov 64   ;;  %s1437_s0 = inlined_call_operand.vmem [shape: bf16[8,2,16], index: 0, kind: input, shape index: {}]   ;;  %s1438_s1 = inlined_call_operand.vmem [shape: bf16[2,8], index: 1, kind: input, shape index: {}]   ;;  %s1439_s2 = inlined_call_operand.vmem [shape: bf16[16,128], index: 2, kind: input, shape index: {}]   ;;  %s1440_s3 = inlined_call_operand.vmem [shape: bf16[32,128], index: 3, kind: input, shape index: {}]   ;;  %s1441_s4 = inlined_call_operand.vmem [shape: f32[1,128], index: 4, kind: input, shape index: {}]   ;;  %s1442_s5 = inlined_call_operand.vmem [shape: bf16[32,200], index: 5, kind: input, shape index: {}]   ;;  %s1443_s6 = inlined_call_operand.vmem [shape: bf16[8,200], index: 6, kind: input, shape index: {}]   ;;  %s1444_s7 = inlined_call_operand.vmem [shape: f32[1,200], index: 7, kind: input, shape index: {}]   ;;  %s1445_s8 = inlined_call_operand.hbm [shape: bf16[200,32], index: 8, kind: input, shape index: {}]   ;;  %s1446_s9 = inlined_call_operand.vmem [shape: f32[1,32], index: 9, kind: input, shape index: {}]   ;;  %s1447_s10 = inlined_call_operand.vmem [shape: f32[2,16], index: 10, kind: input, shape index: {}]   ;;  %s1448_s11 = inlined_call_operand.vmem [shape: f32[2,48], index: 11, kind: output, shape index: {}]  }
   0x1   :  { %s37_s19 = sshll.u32 %s1445_s8, 4  ;;  %s39_s21 = sshll.u32 %s1192_s20, 4  ;;  %s38_s19 = int_to_ptr.hbm [resolvable:$true] %s37_s19  ;;  %s40_s21 = int_to_ptr.vmem [resolvable:$true] %s39_s21 }
   0x2   :  { %s1194_s23 = smov 4  }
   0x3   :  { %45 = dma.hbm_to_vmem [thread:$0]  %s38_s19, 1600, %s40_s21, [#allocation3], %s1193_s22, %s1193_s22, %s1194_s23  }
   0x4   :  { %1190 = dma.done.wait [#allocation3], 1600  }
   0x5   :  { %1191 = vsyncadd [#allocation3], 4294965696  ;;  %v1267_v0 = vld [vmem:[%s1440_s3 + $0x8] sm:$0xff]  ;;  %v1272_v1 = vld [vmem:[%s1439_s2] sm:$0xff]  ;;  %vm101_vm0 = vcmask 130048   ;;  %v1195_v4 = vmov 0  }
   0x6   :  { %88 = vmatpush.bf16.msra.mxu0 %v1267_v0  ;;  %112 = vmatpush.bf16.msra.mxu2 %v1272_v1  ;;  %v65_v2 = vld [vmem:[%s1437_s0] sm:$0x1]  ;;  %s1196_s12 = smov 32   ;;  %v975_v32 = vld [vmem:[%s1437_s0 + $0x1] sm:$0x1]  ;;  %vm78_vm5 = vcmask 261120  }
   0x7   :  { %v1282_v3 = vld [vmem:[%s1440_s3] sm:$0xff]  ;;  %188 = vmatpush.bf16.msra.mxu3 %v1272_v1  ;;  %247 = vmatpush.bf16.msra.mxu1 %v1267_v0  ;;  %s1197_s23 = smov 16   ;;  %s1198_s24 = smov 112  }
   0x8   :  { %v1302_v6 = vld [vmem:[%s1441_s4] ss:$0 sm:$0xff]  ;;  %v979_v63 = vld [vmem:[%s1437_s0 + $0x2] sm:$0x1] }
   0x9   :  { %973 = vmatmul.msk.bf16.vlgmr.msra.gmra.mxu2 %vm101_vm0, %v65_v2 }
   0xa   :  { %171 = vmatpush.bf16.msrb.mxu2 %v1267_v0  ;;  %89 = vmatpush.bf16.msra.mxu0 %v1282_v3 }
   0xb   :  { %264 = vmatpush.bf16.msrb.mxu3 %v1272_v1  ;;  %248 = vmatpush.bf16.msra.mxu1 %v1282_v3 }
   0xc   :  { %977 = vmatmul.msk.bf16.vlgmr.msra.gmra.mxu3 %vm101_vm0, %v975_v32 }
   0xd   :  { %90 = vmatmul.bf16.vlgmr.msra.gmra.mxu0 %v1195_v4 }
   0xe   :  { %172 = vmatpush.bf16.msrb.mxu2 %v1282_v3  ;;  %323 = vmatpush.bf16.msrb.mxu0 %v1267_v0 }
   0xf   :  { %399 = vmatpush.bf16.msrb.mxu1 %v1267_v0  ;;  %416 = vmatpush.bf16.msra.mxu3 %v1272_v1 }
  0x12   :  { %340 = vmatpush.bf16.msra.mxu2 %v1272_v1  ;;  %324 = vmatpush.bf16.msrb.mxu0 %v1282_v3 }
  0x13   :  { %400 = vmatpush.bf16.msrb.mxu1 %v1282_v3 }
  0x16   :  { %475 = vmatpush.bf16.msra.mxu0 %v1267_v0 }
  0x1a   :  { %476 = vmatpush.bf16.msra.mxu0 %v1282_v3 }
  0x1c   :  { %981 = vmatmul.msk.bf16.vlgmr.msrb.gmra.mxu3 %vm101_vm0, %v979_v63 }
  0x1d   :  { %568 = vmatpush.bf16.msrb.mxu3 %v1272_v1 }
  0x8a   :  { %v91_v5 = vpop.f32.mrf.mxu0 }
  0x8c   :  { %v114_v7 = vpop.f32.mrf.mxu2 }
  0x8d   :  { %v115_v8 = vadd.f32 %v114_v7, %v91_v5 }
  0x8f   :  { %v118_v9 = vadd.f32 %v1302_v6, %v115_v8  ;;  %v190_v36 = vpop.f32.mrf.mxu3 }
  0x91   :  { %1100 = vtanh.f32 %v118_v9  ;;  %v974_v13 = vmul.f32 -1.442695, %v118_v9 }
  0x92   :  { %v93_v10 = vpop.f32.mrf.mxu0 }
  0x93   :  { %1102 = vpow2.f32 %v974_v13 }
  0x94   :  { %v116_v11 = vpop.f32.mrf.mxu2 }
  0x97   :  { %v1101_v12 = vpop.eup %1100  ;;  %v192_v37 = vpop.f32.mrf.mxu3 }
  0x98   :  { %141 = vrot.lane.b32.xlu0 %v1101_v12, %s1196_s12 }
  0x99   :  { %v1103_v14 = vpop.eup %1102 }
  0x9a   :  { %v122_v15 = vadd.f32 1.0, %v1103_v14 }
  0x9c   :  { %1104 = vrcp.f32 %v122_v15  ;;  %v134_v21 = vand.u32 2147483648, %v122_v15  ;;  %vm128_vm2 = vweird.f32 %v122_v15  ;;  %v132_v22 = vand.u32 2147483647, %v122_v15 }
  0x9e   :  { %v135_v24 = vor.u32 1.1754944e-38, %v134_v21  ;;  %vm133_vm4 = vcmp.eq.f32.partialorder %v132_v22, 8.507059e+37 }
  0x9f   :  { %v266_v7 = vpop.f32.mrf.mxu3 }
  0xa2   :  { %v1105_v16 = vpop.eup %1104 }
  0xa3   :  { %v124_v17 = vmul.f32 %v1105_v16, %v122_v15  ;;  %vm129_vm1 = vweird.f32 %v1105_v16 }
  0xa4   :  { %vm130_vm3 = vmor %vm128_vm2, %vm129_vm1 }
  0xa5   :  { %v125_v18 = vsub.f32 1.0, %v124_v17 }
  0xa7   :  { %v126_v19 = vmul.f32 %v1105_v16, %v125_v18  ;;  %v268_v8 = vpop.f32.mrf.mxu3 }
  0xa9   :  { %v127_v20 = vadd.f32 %v1105_v16, %v126_v19 }
  0xab   :  { %v131_v23 = vsel %vm130_vm3, %v1105_v16, %v127_v20 }
  0xac   :  { %v136_v26 = vsel %vm133_vm4, %v135_v24, %v131_v23 }
  0xad   :  { %v139_v28 = vmul.f32 0.0, %v136_v26 }
 0x10a   :  { %v142_v25 = vpop.permute.xlu0 %141 }
 0x10b   :  { %v144_v27 = vmul.f32 %v142_v25, %v136_v26 }
 0x10d   :  { %146 = vrot.lane.b32.xlu0 %v144_v27, %s1196_s12 }
 0x17f   :  { %v147_v29 = vpop.permute.xlu0 %146 }
 0x180   :  { %v149_v30 = vadd.f32 %v147_v29, %v139_v28 }
 0x182   :  { %1106 = vtanh.f32 %v149_v30 }
 0x188   :  { %v1107_v31 = vpop.eup %1106 }
 0x189   :  { %152 = vrot.lane.b32.xlu1 %v1107_v31, %s1196_s12 }
 0x1fb   :  { %v153_v33 = vpop.permute.xlu1 %152 }
 0x1fc   :  { %v155_v34 = vmul.f32 %v153_v33, %v136_v26 }
 0x1fe   :  { %v158_v35 = vpack.c.bf16 %v155_v34, %v155_v34  ;;  %v983_v34 = vld [vmem:[%s1437_s0 + $0x3] sm:$0x1] }
 0x200   :  { %160 = vrot.lane.b32.xlu1 %v158_v35, %s1193_s22 }
 0x272   :  { %v161_v38 = vpop.permute.xlu1 %160 }
 0x273   :  { %976 = vmatmul.msk.bf16.vlgmr.msrb.gmra.mxu2 %vm78_vm5, %v161_v38 }
 0x274   :  { %492 = vmatpush.bf16.msrb.mxu2 %v1272_v1 }
 0x283   :  { %985 = vmatmul.msk.bf16.vlgmr.msra.gmra.mxu2 %vm101_vm0, %v983_v34 }
 0x284   :  { %644 = vmatpush.bf16.msra.mxu2 %v1272_v1 }
 0x2f6   :  { %v174_v39 = vpop.f32.mrf.mxu2 }
 0x2f7   :  { %v191_v40 = vadd.f32 %v190_v36, %v174_v39 }
 0x2f9   :  { %v194_v41 = vadd.f32 %v1302_v6, %v191_v40 }
 0x2fb   :  { %1108 = vtanh.f32 %v194_v41  ;;  %v978_v44 = vmul.f32 -1.442695, %v194_v41 }
 0x2fd   :  { %1110 = vpow2.f32 %v978_v44 }
 0x2fe   :  { %v176_v42 = vpop.f32.mrf.mxu2 }
 0x301   :  { %v1109_v43 = vpop.eup %1108 }
 0x302   :  { %217 = vrot.lane.b32.xlu2 %v1109_v43, %s1196_s12 }
 0x303   :  { %v1111_v45 = vpop.eup %1110 }
 0x304   :  { %v198_v46 = vadd.f32 1.0, %v1111_v45 }
 0x306   :  { %1112 = vrcp.f32 %v198_v46  ;;  %v210_v52 = vand.u32 2147483648, %v198_v46  ;;  %vm204_vm7 = vweird.f32 %v198_v46  ;;  %v208_v53 = vand.u32 2147483647, %v198_v46  ;;  %v342_v39 = vpop.f32.mrf.mxu2 }
 0x308   :  { %v211_v55 = vor.u32 1.1754944e-38, %v210_v52  ;;  %vm209_vm9 = vcmp.eq.f32.partialorder %v208_v53, 8.507059e+37 }
 0x30c   :  { %v1113_v47 = vpop.eup %1112 }
 0x30d   :  { %v200_v48 = vmul.f32 %v1113_v47, %v198_v46  ;;  %vm205_vm6 = vweird.f32 %v1113_v47 }
 0x30e   :  { %vm206_vm8 = vmor %vm204_vm7, %vm205_vm6  ;;  %v344_v40 = vpop.f32.mrf.mxu2 }
 0x30f   :  { %v201_v49 = vsub.f32 1.0, %v200_v48 }
 0x311   :  { %v202_v50 = vmul.f32 %v1113_v47, %v201_v49 }
 0x313   :  { %v203_v51 = vadd.f32 %v1113_v47, %v202_v50 }
 0x315   :  { %v207_v54 = vsel %vm206_vm8, %v1113_v47, %v203_v51 }
 0x316   :  { %v212_v57 = vsel %vm209_vm9, %v211_v55, %v207_v54 }
 0x317   :  { %v215_v59 = vmul.f32 %v212_v57, %v149_v30 }
 0x35c   :  { %v218_v56 = vpop.permute.xlu2 %217 }
 0x35d   :  { %v220_v58 = vmul.f32 %v218_v56, %v212_v57 }
 0x35f   :  { %222 = vrot.lane.b32.xlu2 %v220_v58, %s1196_s12 }
 0x3b9   :  { %v223_v60 = vpop.permute.xlu2 %222 }
 0x3ba   :  { %v225_v61 = vadd.f32 %v223_v60, %v215_v59 }
 0x3bc   :  { %1114 = vtanh.f32 %v225_v61 }
 0x3c2   :  { %v1115_v62 = vpop.eup %1114 }
 0x3c3   :  { %228 = vrot.lane.b32.xlu0 %v1115_v62, %s1196_s12  ;;  %v987_v62 = vld [vmem:[%s1437_s0 + $0x4] sm:$0x1] }
 0x3c4   :  { %989 = vmatmul.msk.bf16.vlgmr.msra.gmra.mxu3 %vm101_vm0, %v987_v62 }
 0x435   :  { %v229_v2 = vpop.permute.xlu0 %228 }
 0x436   :  { %v231_v4 = vmul.f32 %v229_v2, %v212_v57 }
 0x438   :  { %v234_v5 = vpack.c.bf16 %v231_v4, %v231_v4 }
 0x43a   :  { %236 = vrot.lane.b32.xlu1 %v234_v5, %s1193_s22 }
 0x447   :  { %v418_v5 = vpop.f32.mrf.mxu3 }
 0x4ac   :  { %v237_v9 = vpop.permute.xlu1 %236 }
 0x4ad   :  { %980 = vmatmul.msk.bf16.vlgmr.msra.gmra.mxu1 %vm78_vm5, %v237_v9 }
 0x4ae   :  { %551 = vmatpush.bf16.msra.mxu1 %v1267_v0 }
 0x4b2   :  { %552 = vmatpush.bf16.msra.mxu1 %v1282_v3 }
 0x52a   :  { %v250_v10 = vpop.f32.mrf.mxu1 }
 0x52b   :  { %v267_v11 = vadd.f32 %v266_v7, %v250_v10  ;;  %v420_v7 = vpop.f32.mrf.mxu3 }
 0x52d   :  { %v270_v12 = vadd.f32 %v1302_v6, %v267_v11 }
 0x52f   :  { %1116 = vtanh.f32 %v270_v12  ;;  %v982_v15 = vmul.f32 -1.442695, %v270_v12 }
 0x531   :  { %1118 = vpow2.f32 %v982_v15 }
 0x532   :  { %v252_v13 = vpop.f32.mrf.mxu1 }
 0x535   :  { %v1117_v14 = vpop.eup %1116 }
 0x536   :  { %293 = vrot.lane.b32.xlu2 %v1117_v14, %s1196_s12 }
 0x537   :  { %v1119_v16 = vpop.eup %1118 }
 0x538   :  { %v274_v17 = vadd.f32 1.0, %v1119_v16 }
 0x53a   :  { %1120 = vrcp.f32 %v274_v17  ;;  %v286_v23 = vand.u32 2147483648, %v274_v17  ;;  %vm280_vm11 = vweird.f32 %v274_v17  ;;  %v284_v24 = vand.u32 2147483647, %v274_v17 }
 0x53c   :  { %v287_v26 = vor.u32 1.1754944e-38, %v286_v23  ;;  %vm285_vm13 = vcmp.eq.f32.partialorder %v284_v24, 8.507059e+37 }
 0x540   :  { %v1121_v18 = vpop.eup %1120 }
 0x541   :  { %v276_v19 = vmul.f32 %v1121_v18, %v274_v17  ;;  %vm281_vm10 = vweird.f32 %v1121_v18 }
 0x542   :  { %vm282_vm12 = vmor %vm280_vm11, %vm281_vm10 }
 0x543   :  { %v277_v20 = vsub.f32 1.0, %v276_v19 }
 0x545   :  { %v278_v21 = vmul.f32 %v1121_v18, %v277_v20 }
 0x547   :  { %v279_v22 = vadd.f32 %v1121_v18, %v278_v21 }
 0x549   :  { %v283_v25 = vsel %vm282_vm12, %v1121_v18, %v279_v22 }
 0x54a   :  { %v288_v28 = vsel %vm285_vm13, %v287_v26, %v283_v25 }
 0x54b   :  { %v291_v30 = vmul.f32 %v288_v28, %v225_v61 }
 0x590   :  { %v294_v27 = vpop.permute.xlu2 %293 }
 0x591   :  { %v296_v29 = vmul.f32 %v294_v27, %v288_v28 }
 0x593   :  { %298 = vrot.lane.b32.xlu0 %v296_v29, %s1196_s12 }
 0x605   :  { %v299_v31 = vpop.permute.xlu0 %298 }
 0x606   :  { %v301_v32 = vadd.f32 %v299_v31, %v291_v30 }
 0x608   :  { %1122 = vtanh.f32 %v301_v32 }
 0x60e   :  { %v1123_v33 = vpop.eup %1122 }
 0x60f   :  { %304 = vrot.lane.b32.xlu1 %v1123_v33, %s1196_s12  ;;  %v991_v33 = vld [vmem:[%s1437_s0 + $0x5] sm:$0x1] }
 0x610   :  { %993 = vmatmul.msk.bf16.vlgmr.msrb.gmra.mxu2 %vm101_vm0, %v991_v33 }
 0x681   :  { %v305_v35 = vpop.permute.xlu1 %304 }
 0x682   :  { %v307_v36 = vmul.f32 %v305_v35, %v288_v28 }
 0x684   :  { %v310_v37 = vpack.c.bf16 %v307_v36, %v307_v36 }
 0x686   :  { %312 = vrot.lane.b32.xlu2 %v310_v37, %s1193_s22 }
 0x693   :  { %v494_v37 = vpop.f32.mrf.mxu2 }
 0x6e0   :  { %v313_v38 = vpop.permute.xlu2 %312 }
 0x6e1   :  { %984 = vmatmul.msk.bf16.vlgmr.msrb.gmra.mxu0 %vm78_vm5, %v313_v38  ;;  %v496_v38 = vpop.f32.mrf.mxu2 }
 0x6e2   :  { %627 = vmatpush.bf16.msrb.mxu0 %v1267_v0 }
 0x6e6   :  { %628 = vmatpush.bf16.msrb.mxu0 %v1282_v3 }
 0x75e   :  { %v326_v41 = vpop.f32.mrf.mxu0 }
 0x75f   :  { %v343_v42 = vadd.f32 %v342_v39, %v326_v41 }
 0x761   :  { %v346_v43 = vadd.f32 %v1302_v6, %v343_v42 }
 0x763   :  { %1124 = vtanh.f32 %v346_v43  ;;  %v986_v45 = vmul.f32 -1.442695, %v346_v43 }
 0x765   :  { %1126 = vpow2.f32 %v986_v45 }
 0x766   :  { %v328_v1 = vpop.f32.mrf.mxu0 }
 0x769   :  { %v1125_v44 = vpop.eup %1124 }
 0x76a   :  { %369 = vrot.lane.b32.xlu0 %v1125_v44, %s1196_s12 }
 0x76b   :  { %v1127_v46 = vpop.eup %1126 }
 0x76c   :  { %v350_v47 = vadd.f32 1.0, %v1127_v46 }
 0x76e   :  { %1128 = vrcp.f32 %v350_v47  ;;  %v362_v51 = vand.u32 2147483648, %v350_v47  ;;  %vm356_vm15 = vweird.f32 %v350_v47  ;;  %v360_v52 = vand.u32 2147483647, %v350_v47 }
 0x770   :  { %v363_v54 = vor.u32 1.1754944e-38, %v362_v51  ;;  %vm361_vm2 = vcmp.eq.f32.partialorder %v360_v52, 8.507059e+37 }
 0x774   :  { %v1129_v48 = vpop.eup %1128 }
 0x775   :  { %v352_v0 = vmul.f32 %v1129_v48, %v350_v47  ;;  %vm357_vm14 = vweird.f32 %v1129_v48 }
 0x776   :  { %vm358_vm1 = vmor %vm356_vm15, %vm357_vm14 }
 0x777   :  { %v353_v49 = vsub.f32 1.0, %v352_v0 }
 0x779   :  { %v354_v3 = vmul.f32 %v1129_v48, %v353_v49 }
 0x77b   :  { %v355_v50 = vadd.f32 %v1129_v48, %v354_v3 }
 0x77d   :  { %v359_v53 = vsel %vm358_vm1, %v1129_v48, %v355_v50 }
 0x77e   :  { %v364_v56 = vsel %vm361_vm2, %v363_v54, %v359_v53 }
 0x77f   :  { %v367_v58 = vmul.f32 %v364_v56, %v301_v32 }
 0x7dc   :  { %v370_v55 = vpop.permute.xlu0 %369 }
 0x7dd   :  { %v372_v57 = vmul.f32 %v370_v55, %v364_v56 }
 0x7df   :  { %374 = vrot.lane.b32.xlu1 %v372_v57, %s1196_s12 }
 0x851   :  { %v375_v59 = vpop.permute.xlu1 %374 }
 0x852   :  { %v377_v60 = vadd.f32 %v375_v59, %v367_v58 }
 0x854   :  { %1130 = vtanh.f32 %v377_v60 }
 0x85a   :  { %v1131_v61 = vpop.eup %1130 }
 0x85b   :  { %380 = vrot.lane.b32.xlu2 %v1131_v61, %s1196_s12  ;;  %v995_v61 = vld [vmem:[%s1437_s0 + $0x6] sm:$0x1] }
 0x85c   :  { %997 = vmatmul.msk.bf16.vlgmr.msrb.gmra.mxu3 %vm101_vm0, %v995_v61  ;;  %v1017_v61 = vld [vmem:[%s1442_s5 + $0x18] sm:$0xf0] }
 0x8b5   :  { %v381_v63 = vpop.permute.xlu2 %380 }
 0x8b6   :  { %v383_v2 = vmul.f32 %v381_v63, %v364_v56 }
 0x8b8   :  { %v386_v4 = vpack.c.bf16 %v383_v2, %v383_v2 }
 0x8ba   :  { %388 = vrot.lane.b32.xlu0 %v386_v4, %s1193_s22 }
 0x92c   :  { %v389_v8 = vpop.permute.xlu0 %388 }
 0x92d   :  { %988 = vmatmul.msk.bf16.vlgmr.msrb.gmra.mxu1 %vm78_vm5, %v389_v8 }
 0x9aa   :  { %v402_v9 = vpop.f32.mrf.mxu1 }
 0x9ab   :  { %v419_v10 = vadd.f32 %v418_v5, %v402_v9  ;;  %v570_v5 = vpop.f32.mrf.mxu3 }
 0x9ad   :  { %v422_v11 = vadd.f32 %v1302_v6, %v419_v10 }
 0x9af   :  { %1132 = vtanh.f32 %v422_v11  ;;  %v990_v14 = vmul.f32 -1.442695, %v422_v11 }
 0x9b1   :  { %1134 = vpow2.f32 %v990_v14 }
 0x9b2   :  { %v404_v12 = vpop.f32.mrf.mxu1 }
 0x9b3   :  { %v572_v7 = vpop.f32.mrf.mxu3 }
 0x9b4   :  { %v1015_v7 = vld [vmem:[%s1442_s5 + $0x10] sm:$0xf] }
 0x9b5   :  { %v1133_v13 = vpop.eup %1132 }
 0x9b6   :  { %445 = vrot.lane.b32.xlu1 %v1133_v13, %s1196_s12 }
 0x9b7   :  { %v1135_v15 = vpop.eup %1134 }
 0x9b8   :  { %v426_v16 = vadd.f32 1.0, %v1135_v15 }
 0x9ba   :  { %1136 = vrcp.f32 %v426_v16  ;;  %v438_v22 = vand.u32 2147483648, %v426_v16  ;;  %vm432_vm4 = vweird.f32 %v426_v16  ;;  %v436_v23 = vand.u32 2147483647, %v426_v16 }
 0x9bc   :  { %v439_v25 = vor.u32 1.1754944e-38, %v438_v22  ;;  %vm437_vm7 = vcmp.eq.f32.partialorder %v436_v23, 8.507059e+37 }
 0x9c0   :  { %v1137_v17 = vpop.eup %1136 }
 0x9c1   :  { %v428_v18 = vmul.f32 %v1137_v17, %v426_v16  ;;  %vm433_vm3 = vweird.f32 %v1137_v17 }
 0x9c2   :  { %vm434_vm6 = vmor %vm432_vm4, %vm433_vm3  ;;  %vm704_vm4 = vcmask 1043456  }
 0x9c3   :  { %v429_v19 = vsub.f32 1.0, %v428_v18 }
 0x9c5   :  { %v430_v20 = vmul.f32 %v1137_v17, %v429_v19 }
 0x9c7   :  { %v431_v21 = vadd.f32 %v1137_v17, %v430_v20 }
 0x9c9   :  { %v435_v24 = vsel %vm434_vm6, %v1137_v17, %v431_v21  ;;  %vm700_vm6 = vcmask 64512  }
 0x9ca   :  { %v440_v27 = vsel %vm437_vm7, %v439_v25, %v435_v24  ;;  %vm948_vm7 = vcmask 123904  }
 0x9cb   :  { %v443_v29 = vmul.f32 %v440_v27, %v377_v60 }
 0xa28   :  { %v446_v26 = vpop.permute.xlu1 %445 }
 0xa29   :  { %v448_v28 = vmul.f32 %v446_v26, %v440_v27 }
 0xa2b   :  { %450 = vrot.lane.b32.xlu2 %v448_v28, %s1196_s12 }
 0xa85   :  { %v451_v30 = vpop.permute.xlu2 %450 }
 0xa86   :  { %v453_v31 = vadd.f32 %v451_v30, %v443_v29 }
 0xa88   :  { %1138 = vtanh.f32 %v453_v31 }
 0xa8e   :  { %v1139_v32 = vpop.eup %1138 }
 0xa8f   :  { %456 = vrot.lane.b32.xlu0 %v1139_v32, %s1196_s12  ;;  %v999_v32 = vld [vmem:[%s1437_s0 + $0x7] sm:$0x1] }
 0xa90   :  { %1001 = vmatmul.msk.bf16.vlgmr.msra.gmra.mxu2 %vm101_vm0, %v999_v32 }
 0xb01   :  { %v457_v34 = vpop.permute.xlu0 %456 }
 0xb02   :  { %v459_v35 = vmul.f32 %v457_v34, %v440_v27 }
 0xb04   :  { %v462_v36 = vpack.c.bf16 %v459_v35, %v459_v35 }
 0xb06   :  { %464 = vrot.lane.b32.xlu1 %v462_v36, %s1193_s22 }
 0xb13   :  { %v646_v36 = vpop.f32.mrf.mxu2 }
 0xb78   :  { %v465_v39 = vpop.permute.xlu1 %464 }
 0xb79   :  { %992 = vmatmul.msk.bf16.vlgmr.msra.gmra.mxu0 %vm78_vm5, %v465_v39 }
 0xbf6   :  { %v478_v40 = vpop.f32.mrf.mxu0 }
 0xbf7   :  { %v495_v41 = vadd.f32 %v494_v37, %v478_v40  ;;  %v648_v37 = vpop.f32.mrf.mxu2 }
 0xbf8   :  { %v1090_v37 = vld [vmem:[#allocation2 + $0x58] sm:$0xff] }
 0xbf9   :  { %v498_v42 = vadd.f32 %v1302_v6, %v495_v41 }
 0xbfb   :  { %1140 = vtanh.f32 %v498_v42  ;;  %v994_v44 = vmul.f32 -1.442695, %v498_v42 }
 0xbfd   :  { %1142 = vpow2.f32 %v994_v44 }
 0xbfe   :  { %v480_v43 = vpop.f32.mrf.mxu0 }
 0xc01   :  { %v1141_v1 = vpop.eup %1140 }
 0xc02   :  { %521 = vrot.lane.b32.xlu2 %v1141_v1, %s1196_s12 }
 0xc03   :  { %v1143_v45 = vpop.eup %1142 }
 0xc04   :  { %v502_v46 = vadd.f32 1.0, %v1143_v45 }
 0xc06   :  { %1144 = vrcp.f32 %v502_v46  ;;  %v514_v50 = vand.u32 2147483648, %v502_v46  ;;  %vm508_vm9 = vweird.f32 %v502_v46  ;;  %v512_v51 = vand.u32 2147483647, %v502_v46 }
 0xc08   :  { %v515_v53 = vor.u32 1.1754944e-38, %v514_v50  ;;  %vm513_vm11 = vcmp.eq.f32.partialorder %v512_v51, 8.507059e+37 }
 0xc0c   :  { %v1145_v47 = vpop.eup %1144 }
 0xc0d   :  { %v504_v48 = vmul.f32 %v1145_v47, %v502_v46  ;;  %vm509_vm8 = vweird.f32 %v1145_v47 }
 0xc0e   :  { %vm510_vm10 = vmor %vm508_vm9, %vm509_vm8  ;;  %vm954_vm8 = vcmask 386176  }
 0xc0f   :  { %v505_v0 = vsub.f32 1.0, %v504_v48 }
 0xc11   :  { %v506_v49 = vmul.f32 %v1145_v47, %v505_v0 }
 0xc13   :  { %v507_v3 = vadd.f32 %v1145_v47, %v506_v49 }
 0xc15   :  { %v511_v52 = vsel %vm510_vm10, %v1145_v47, %v507_v3 }
 0xc16   :  { %v516_v55 = vsel %vm513_vm11, %v515_v53, %v511_v52 }
 0xc17   :  { %v519_v57 = vmul.f32 %v516_v55, %v453_v31 }
 0xc5c   :  { %v522_v54 = vpop.permute.xlu2 %521 }
 0xc5d   :  { %v524_v56 = vmul.f32 %v522_v54, %v516_v55 }
 0xc5f   :  { %526 = vrot.lane.b32.xlu0 %v524_v56, %s1196_s12 }
 0xcd1   :  { %v527_v58 = vpop.permute.xlu0 %526 }
 0xcd2   :  { %v529_v59 = vadd.f32 %v527_v58, %v519_v57 }
 0xcd4   :  { %1146 = vtanh.f32 %v529_v59 }
 0xcda   :  { %v1147_v60 = vpop.eup %1146 }
 0xcdb   :  { %532 = vrot.lane.b32.xlu1 %v1147_v60, %s1196_s12  ;;  %v1077_v60 = vld [vmem:[%s1442_s5 + $0x14] sm:$0xf] }
 0xd4d   :  { %v533_v62 = vpop.permute.xlu1 %532 }
 0xd4e   :  { %v535_v63 = vmul.f32 %v533_v62, %v516_v55 }
 0xd50   :  { %v538_v2 = vpack.c.bf16 %v535_v63, %v535_v63  ;;  %v1020_v63 = vor.u32 %v1077_v60, %v1017_v61 }
 0xd52   :  { %540 = vrot.lane.b32.xlu2 %v538_v2, %s1193_s22  ;;  %v1075_v2 = vld [vmem:[%s1442_s5 + $0x4] sm:$0xf]  ;;  %782 = vmatpush.bf16.msrb.mxu2 %v1020_v63 }
 0xdac   :  { %v541_v4 = vpop.permute.xlu2 %540 }
 0xdad   :  { %996 = vmatmul.msk.bf16.vlgmr.msra.gmra.mxu1 %vm78_vm5, %v541_v4 }
 0xe2a   :  { %v554_v8 = vpop.f32.mrf.mxu1 }
 0xe2b   :  { %v571_v9 = vadd.f32 %v570_v5, %v554_v8  ;;  %v1009_v5 = vld [vmem:[%s1442_s5 + $0x8] sm:$0xf0]  ;;  %v1078_v8 = vld [vmem:[%s1442_s5 + $0x14] sm:$0xf0] }
 0xe2d   :  { %v574_v10 = vadd.f32 %v1302_v6, %v571_v9 }
 0xe2f   :  { %1148 = vtanh.f32 %v574_v10  ;;  %v998_v13 = vmul.f32 -1.442695, %v574_v10  ;;  %v1012_v10 = vor.u32 %v1075_v2, %v1009_v5  ;;  %v938_v2 = vld [vmem:[%s1447_s10] sm:$0x3] }
 0xe31   :  { %1150 = vpow2.f32 %v998_v13  ;;  %v1007_v13 = vld [vmem:[%s1442_s5] sm:$0xf]  ;;  %783 = vmatpush.bf16.msrb.mxu2 %v1012_v10 }
 0xe32   :  { %v556_v11 = vpop.f32.mrf.mxu1 }
 0xe33   :  { %v1016_v11 = vor.u32 %v1078_v8, %v1015_v7 }
 0xe35   :  { %v1149_v12 = vpop.eup %1148  ;;  %769 = vmatpush.bf16.msra.mxu0 %v1016_v11 }
 0xe36   :  { %597 = vrot.lane.b32.xlu0 %v1149_v12, %s1196_s12 }
 0xe37   :  { %v1151_v14 = vpop.eup %1150 }
 0xe38   :  { %v578_v15 = vadd.f32 1.0, %v1151_v14  ;;  %v1076_v14 = vld [vmem:[%s1442_s5 + $0x4] sm:$0xf0] }
 0xe3a   :  { %1152 = vrcp.f32 %v578_v15  ;;  %v590_v21 = vand.u32 2147483648, %v578_v15  ;;  %vm584_vm13 = vweird.f32 %v578_v15  ;;  %v588_v22 = vand.u32 2147483647, %v578_v15 }
 0xe3c   :  { %v591_v24 = vor.u32 1.1754944e-38, %v590_v21  ;;  %vm589_vm15 = vcmp.eq.f32.partialorder %v588_v22, 8.507059e+37  ;;  %v1086_v22 = vld [vmem:[#allocation2 + $0x38] sm:$0xff] }
 0xe40   :  { %v1153_v16 = vpop.eup %1152 }
 0xe41   :  { %v580_v17 = vmul.f32 %v1153_v16, %v578_v15  ;;  %vm585_vm12 = vweird.f32 %v1153_v16 }
 0xe42   :  { %vm586_vm14 = vmor %vm584_vm13, %vm585_vm12 }
 0xe43   :  { %v581_v18 = vsub.f32 1.0, %v580_v17  ;;  %v1008_v17 = vor.u32 %v1076_v14, %v1007_v13 }
 0xe45   :  { %v582_v19 = vmul.f32 %v1153_v16, %v581_v18  ;;  %v693_v18 = vld [vmem:[%s1438_s1] sm:$0x1]  ;;  %770 = vmatpush.bf16.msra.mxu0 %v1008_v17 }
 0xe47   :  { %v583_v20 = vadd.f32 %v1153_v16, %v582_v19 }
 0xe49   :  { %v587_v23 = vsel %vm586_vm14, %v1153_v16, %v583_v20 }
 0xe4a   :  { %v592_v26 = vsel %vm589_vm15, %v591_v24, %v587_v23  ;;  %v825_v23 = vld [vmem:[#allocation2 + $0x60] sm:$0xf]  ;;  %v1085_v24 = vld [vmem:[#allocation2 + $0x30] sm:$0xff] }
 0xe4b   :  { %v595_v28 = vmul.f32 %v592_v26, %v529_v59  ;;  %v694_v59 = vld [vmem:[%s1443_s6] sm:$0xff] }
 0xe4c   :  { %v697_v62 = vunpack.c.h.b16 %v694_v59  ;;  %v696_v4 = vunpack.c.l.b16 %v694_v59 }
 0xe4e   :  { %v699_v9 = vpack.c.b16 %v697_v62, %v697_v62  ;;  %v698_v12 = vpack.c.b16 %v696_v4, %v696_v4 }
 0xe50   :  { %v709_v15 = vsel %vm704_vm4, %v699_v9, 0  ;;  %v706_v16 = vsel %vm704_vm4, %v698_v12, 0 }
 0xe51   :  { %731 = vmatpush.bf16.msra.mxu3 %v709_v15  ;;  %718 = vmatpush.bf16.msrb.mxu1 %v706_v16 }
 0xe54   :  { %1004 = vmatmul.msk.bf16.vlgmr.msra.gmra.mxu3 %vm700_vm6, %v693_v18  ;;  %1003 = vmatmul.msk.bf16.vlgmr.msrb.gmra.mxu1 %vm700_vm6, %v693_v18 }
 0xe55   :  { %912 = vmatpush.bf16.msra.mxu1 %v1086_v22 }
 0xe59   :  { %913 = vmatpush.bf16.msra.mxu1 %v1085_v24 }
 0xea8   :  { %v598_v25 = vpop.permute.xlu0 %597 }
 0xea9   :  { %v600_v27 = vmul.f32 %v598_v25, %v592_v26  ;;  %v879_v25 = vunpack.c.l.b16 %v825_v23 }
 0xeab   :  { %602 = vrot.lane.b32.xlu1 %v600_v27, %s1196_s12  ;;  %v1084_v27 = vld [vmem:[#allocation2 + $0x28] sm:$0xff] }
 0xeac   :  { %914 = vmatpush.bf16.msra.mxu1 %v1084_v27 }
 0xed1   :  { %v720_v32 = vpop.f32.mrf.mxu1 }
 0xf1d   :  { %v603_v29 = vpop.permute.xlu1 %602 }
 0xf1e   :  { %v605_v30 = vadd.f32 %v603_v29, %v595_v28  ;;  %v1083_v29 = vld [vmem:[#allocation2 + $0x20] sm:$0xff] }
 0xf1f   :  { %915 = vmatpush.bf16.msra.mxu1 %v1083_v29 }
 0xf20   :  { %1154 = vtanh.f32 %v605_v30 }
 0xf26   :  { %v1155_v31 = vpop.eup %1154 }
 0xf27   :  { %608 = vrot.lane.b32.xlu2 %v1155_v31, %s1196_s12  ;;  %v1081_v31 = vld [vmem:[#allocation2 + $0x10] sm:$0xff] }
 0xf81   :  { %v609_v33 = vpop.permute.xlu2 %608 }
 0xf82   :  { %v611_v34 = vmul.f32 %v609_v33, %v592_v26  ;;  %v892_v26 = vpack.c.b16 %v879_v25, %v879_v25  ;;  %v733_v33 = vpop.f32.mrf.mxu3 }
 0xf84   :  { %v614_v35 = vpack.c.bf16 %v611_v34, %v611_v34  ;;  %v910_v28 = vsel %vm704_vm4, %v892_v26, 0  ;;  %v722_v34 = vpop.f32.mrf.mxu1 }
 0xf85   :  { %928 = vmatpush.bf16.msrb.mxu3 %v910_v28 }
 0xf86   :  { %616 = vrot.lane.b32.xlu0 %v614_v35, %s1193_s22 }
 0xf89   :  { %929 = vmatpush.bf16.msrb.mxu3 %v1090_v37 }
 0xff8   :  { %v617_v38 = vpop.permute.xlu0 %616 }
 0xff9   :  { %1000 = vmatmul.msk.bf16.vlgmr.msrb.gmra.mxu0 %vm78_vm5, %v617_v38  ;;  %v1080_v38 = vld [vmem:[#allocation2 + $0x8] sm:$0xff] }
0x1076   :  { %v630_v39 = vpop.f32.mrf.mxu0 }
0x1077   :  { %v647_v40 = vadd.f32 %v646_v36, %v630_v39  ;;  %v735_v36 = vpop.f32.mrf.mxu3  ;;  %v1089_v39 = vld [vmem:[#allocation2 + $0x50] sm:$0xff] }
0x1078   :  { %930 = vmatpush.bf16.msrb.mxu3 %v1089_v39 }
0x1079   :  { %v650_v41 = vadd.f32 %v1302_v6, %v647_v40  ;;  %v1079_v40 = vld [vmem:[#allocation2] sm:$0xff] }
0x107b   :  { %1156 = vtanh.f32 %v650_v41  ;;  %v1002_v1 = vmul.f32 -1.442695, %v650_v41  ;;  %v1088_v41 = vld [vmem:[#allocation2 + $0x48] sm:$0xff] }
0x107c   :  { %931 = vmatpush.bf16.msrb.mxu3 %v1088_v41 }
0x107d   :  { %1158 = vpow2.f32 %v1002_v1 }
0x107e   :  { %v632_v42 = vpop.f32.mrf.mxu0 }
0x107f   :  { %v1087_v42 = vld [vmem:[#allocation2 + $0x40] sm:$0xff] }
0x1080   :  { %932 = vmatpush.bf16.msrb.mxu3 %v1087_v42 }
0x1081   :  { %v1157_v43 = vpop.eup %1156 }
0x1082   :  { %673 = vrot.lane.b32.xlu1 %v1157_v43, %s1196_s12  ;;  %v789_v43 = vld [vmem:[%s1444_s7] sm:$0x3] }
0x1083   :  { %v1159_v44 = vpop.eup %1158  ;;  %v791_v1 = vperm.slane %v789_v43, 0 }
0x1084   :  { %v654_v45 = vadd.f32 1.0, %v1159_v44 }
0x1086   :  { %1160 = vrcp.f32 %v654_v45  ;;  %v666_v3 = vand.u32 2147483648, %v654_v45  ;;  %vm660_vm1 = vweird.f32 %v654_v45  ;;  %v664_v50 = vand.u32 2147483647, %v654_v45 }
0x1088   :  { %v667_v51 = vor.u32 1.1754944e-38, %v666_v3  ;;  %vm665_vm3 = vcmp.eq.f32.partialorder %v664_v50, 8.507059e+37 }
0x108c   :  { %v1161_v46 = vpop.eup %1160 }
0x108d   :  { %v656_v47 = vmul.f32 %v1161_v46, %v654_v45  ;;  %vm661_vm0 = vweird.f32 %v1161_v46 }
0x108e   :  { %vm662_vm2 = vmor %vm660_vm1, %vm661_vm0 }
0x108f   :  { %v657_v48 = vsub.f32 1.0, %v656_v47 }
0x1091   :  { %v658_v0 = vmul.f32 %v1161_v46, %v657_v48  ;;  %v792_v48 = vperm.slane %v789_v43, 1 }
0x1093   :  { %v659_v49 = vadd.f32 %v1161_v46, %v658_v0 }
0x1095   :  { %v663_v6 = vsel %vm662_vm2, %v1161_v46, %v659_v49 }
0x1096   :  { %v668_v53 = vsel %vm665_vm3, %v667_v51, %v663_v6 }
0x1097   :  { %v671_v55 = vmul.f32 %v668_v53, %v605_v30  ;;  %v1082_v30 = vld [vmem:[#allocation2 + $0x18] sm:$0xff] }
0x1098   :  { %916 = vmatpush.bf16.msra.mxu1 %v1082_v30 }
0x109c   :  { %917 = vmatpush.bf16.msra.mxu1 %v1081_v31 }
0x10a0   :  { %918 = vmatpush.bf16.msra.mxu1 %v1080_v38 }
0x10a4   :  { %919 = vmatpush.bf16.msra.mxu1 %v1079_v40 }
0x10f4   :  { %v674_v52 = vpop.permute.xlu1 %673 }
0x10f5   :  { %v676_v54 = vmul.f32 %v674_v52, %v668_v53 }
0x10f7   :  { %678 = vrot.lane.b32.xlu2 %v676_v54, %s1196_s12 }
0x1151   :  { %v679_v56 = vpop.permute.xlu2 %678 }
0x1152   :  { %v681_v57 = vadd.f32 %v679_v56, %v671_v55  ;;  %v1099_v55 = vld [vmem:[%s1446_s9] ss:$0 sm:$0xff] }
0x1154   :  { %1162 = vtanh.f32 %v681_v57 }
0x115a   :  { %v1163_v58 = vpop.eup %1162 }
0x115b   :  { %684 = vrot.lane.b32.xlu0 %v1163_v58, %s1196_s12 }
0x11cd   :  { %v685_v19 = vpop.permute.xlu0 %684 }
0x11ce   :  { %v687_v20 = vmul.f32 %v685_v19, %v668_v53 }
0x11d0   :  { %v688_v21 = vpack.c.bf16 %v687_v20, %v687_v20 }
0x11d2   :  { %738 = vrot.lane.b32.xlu1 %v688_v21, %s1193_s22 }
0x1244   :  { %v739_v35 = vpop.permute.xlu1 %738 }
0x1245   :  { %1021 = vmatmul.msk.bf16.vlgmr.msra.gmra.mxu0 %vm78_vm5, %v739_v35  ;;  %1022 = vmatmul.msk.bf16.vlgmr.msrb.gmra.mxu2 %vm78_vm5, %v739_v35  ;;  %vm905_vm5 = vcmask 588800  }
0x12c2   :  { %v772_v44 = vpop.f32.mrf.mxu0 }
0x12c3   :  { %v773_v45 = vadd.f32 %v772_v44, %v720_v32 }
0x12c5   :  { %v795_v46 = vadd.f32 %v791_v1, %v773_v45 }
0x12c7   :  { %v797_v47 = vmax.f32 %v795_v46, 0.0 }
0x12c8   :  { %v785_v0 = vpop.f32.mrf.mxu2 }
0x12c9   :  { %v799_v49 = vpack.c.bf16 %v797_v47, %v797_v47  ;;  %v786_v3 = vadd.f32 %v785_v0, %v733_v33 }
0x12ca   :  { %v774_v50 = vpop.f32.mrf.mxu0 }
0x12cb   :  { %v796_v6 = vadd.f32 %v792_v48, %v786_v3  ;;  %920 = vmatmul.bf16.vlgmr.msra.gmra.mxu1 %v799_v49 }
0x12cd   :  { %v798_v51 = vmax.f32 %v796_v6, 0.0 }
0x12cf   :  { %v800_v52 = vpack.c.bf16 %v798_v51, %v798_v51 }
0x12d0   :  { %v787_v53 = vpop.f32.mrf.mxu2 }
0x12d1   :  { %1071 = vmatmul.msk.bf16.vlgmr.msrb.gmra.mxu3 %vm905_vm5, %v800_v52 }
0x1348   :  { %v921_v54 = vpop.f32.mrf.mxu1 }
0x1349   :  { %v922_v57 = vadd.f32 %v1099_v55, %v921_v54 }
0x1350   :  { %v923_v56 = vpop.f32.mrf.mxu1 }
0x1354   :  { %v934_v58 = vpop.f32.mrf.mxu3 }
0x1355   :  { %v935_v59 = vadd.f32 %v934_v58, %v922_v57 }
0x1357   :  { %v939_v60 = vmul.f32 0.5, %v935_v59  ;;  %951 = vrot.lane.b32.xlu0 %v935_v59, %s1197_s23 }
0x1359   :  { %v940_v61 = vmul.f32 1.442695, %v939_v60 }
0x135b   :  { %1164 = vpow2.f32 %v940_v61 }
0x135c   :  { %v936_v62 = vpop.f32.mrf.mxu3 }
0x1361   :  { %v1165_v63 = vpop.eup %1164 }
0x1362   :  { %943 = vrot.lane.b32.xlu2 %v1165_v63, %s1198_s24 }
0x13bc   :  { %v944_v4 = vpop.permute.xlu2 %943 }
0x13bd   :  { %v946_v5 = vmul.f32 %v944_v4, %v938_v2 }
0x13bf   :  { %v947_v7 = vadd.f32 %v946_v5, %v935_v59 }
0x13c1   :  { %949 = vst.msk [vmem:[%s1448_s11] sm:$0x3] %vm948_vm7, %v947_v7 }
0x13c9   :  { %v952_v8 = vpop.permute.xlu0 %951 }
0x13ca   :  { %955 = vst.msk [vmem:[%s1448_s11] sm:$0x3] %vm954_vm8, %v952_v8 }
0x13cb   :  { %960 = vsyncpa [#allocation3], 1 }

</bundles_post_ra>
